<compile_context>
chip_gen: v7x
topology: tpu7x:2x2x1
jax: 0.10.0
libtpu: 0.0.40
codegen_flags: <defaults>
</compile_context>

<pallas_src>
import functools
import math

import jax
import jax.numpy as jnp
from jax.experimental import pallas as pl
from jax.experimental.pallas import tpu as pltpu


def _build_pe_table(d_model: int, max_len: int) -> jnp.ndarray:
    """Deterministic sinusoidal table, identical to the PyTorch __init__ (2-D)."""
    position = jnp.arange(max_len, dtype=jnp.float32)[:, None]            # (L, 1)
    div_term = jnp.exp(
        jnp.arange(0, d_model, 2, dtype=jnp.float32)
        * (-math.log(10000.0) / d_model)
    )                                                                     # (E/2,)
    pe = jnp.zeros((max_len, d_model), dtype=jnp.float32)
    pe = pe.at[:, 0::2].set(jnp.sin(position * div_term))
    pe = pe.at[:, 1::2].set(jnp.cos(position * div_term))
    return pe                                                             # (L, E)


def _pe_dropout_kernel(seed_ref, x_ref, pe_ref, o_ref, *,
                       p: float, training: bool, rows_per_tile: int):
    # x_ref:  (TS, B, E) VMEM tile
    # pe_ref: (TS, E)    VMEM tile, broadcast over batch inside the kernel
    x = x_ref[...]
    pe = pe_ref[...]
    y = x + pe[:, None, :]

    if training and p > 0.0:
        keep_prob = 1.0 - p
        if keep_prob <= 0.0:
            # torch Dropout(p=1.0) zeroes everything.
            y = jnp.zeros_like(y)
        else:
            ts, b, e = y.shape
            # Portable counter-based PRNG: unique counter per element, salted
            # with the *global* row index so every grid step gets a fresh mask.
            row = jax.lax.broadcasted_iota(jnp.int32, (ts, b, e), 0)
            bat = jax.lax.broadcasted_iota(jnp.int32, (ts, b, e), 1)
            lan = jax.lax.broadcasted_iota(jnp.int32, (ts, b, e), 2)
            row0 = pl.program_id(0) * rows_per_tile
            idx = ((row0 + row) * b + bat) * e + lan                      # int32
            h = idx.astype(jnp.uint32)
            seed = seed_ref[0].astype(jnp.uint32)
            h = h ^ (seed * jnp.uint32(0x9E3779B9))
            # splitmix32-style finalizer (all VPU int ops, hidden under DMA).
            h = (h ^ (h >> 16)) * jnp.uint32(0x7FEB352D)
            h = (h ^ (h >> 15)) * jnp.uint32(0x846CA68B)
            h = h ^ (h >> 16)
            threshold = jnp.uint32(min(int(p * float(2**32)), 2**32 - 1))
            keep = h >= threshold                                         # P(keep)=1-p
            y = jnp.where(keep, y * jnp.float32(1.0 / keep_prob),
                          jnp.zeros_like(y))

    o_ref[...] = y.astype(o_ref.dtype)


def _choose_row_tile(S: int, B: int, E: int, itemsize: int,
                     target_bytes: int = 2 * 1024 * 1024) -> int:
    """Rows per tile: ~2 MiB of x per tile, multiple of 8 (sublane tiling)."""
    rows = max(1, target_bytes // max(1, B * E * itemsize))
    if rows >= S:
        return S
    return max(8, (rows // 8) * 8)


def positional_encoding(x, pe_table, *, p: float = 0.1,
                        training: bool = True, seed: int = 0):
    """x: (S, B, E) float32. pe_table: (max_len, E)."""
    S, B, E = x.shape
    pe_slice = pe_table[:S]                                     # (S, E)
    seed_arr = jnp.array([seed], dtype=jnp.int32)
    ts = _choose_row_tile(S, B, E, x.dtype.itemsize)
    grid = (pl.cdiv(S, ts),)

    kernel = functools.partial(_pe_dropout_kernel, p=p, training=training,
                               rows_per_tile=ts)
    return pl.pallas_call(
        kernel,
        out_shape=jax.ShapeDtypeStruct((S, B, E), x.dtype),
        grid_spec=pltpu.PrefetchScalarGridSpec(
            num_scalar_prefetch=1,               # seed lands in SMEM
            grid=grid,
            in_specs=[
                pl.BlockSpec((ts, B, E), lambda i, seed: (i, 0, 0)),
                pl.BlockSpec((ts, E),    lambda i, seed: (i, 0)),
            ],
            out_specs=pl.BlockSpec((ts, B, E), lambda i, seed: (i, 0, 0)),
        ),
        compiler_params=pltpu.CompilerParams(
            dimension_semantics=("parallel",),    # shard S-tiles across TCs (v7x)
            vmem_limit_bytes=32 * 1024 * 1024,
        ),
    )(seed_arr, x, pe_slice)


if __name__ == "__main__":
    # Small shapes consistent with the module's (S, N, E) forward convention.
    S, B, E = 8, 2, 32
    MAX_LEN = 64

    key = jax.random.PRNGKey(0)
    x = jax.random.normal(key, (S, B, E), dtype=jnp.float32)
    pe_table = _build_pe_table(d_model=E, max_len=MAX_LEN)      # (MAX_LEN, E)

    # Training mode: PE add + in-kernel dropout (deterministic given the seed).
    y_train = jax.block_until_ready(
        positional_encoding(x, pe_table, p=0.1, training=True, seed=0))

    # Eval mode (dropout = identity) — check exact semantics against reference.
    y_eval = jax.block_until_ready(
        positional_encoding(x, pe_table, p=0.1, training=False))
    ref = x + pe_table[:S][:, None, :]                          # broadcast (S,1,E)
    assert y_eval.shape == (S, B, E)
    assert jnp.allclose(y_eval, ref, atol=1e-6, rtol=1e-6)

    # Sanity: training output is either 0 or scaled reference at every element.
    scaled = ref / (1.0 - 0.1)
    ok = jnp.all(jnp.isclose(y_train, scaled, atol=1e-5, rtol=1e-5)
                 | (y_train == 0.0))
    assert bool(ok)

    # TODO(synk): in a real training loop the integer seed should be derived
    # from a per-step PRNG key so the dropout mask differs across steps.
    print("KERNEL_OK")
</pallas_src>

<mosaic_0001>
module attributes {stable_mosaic.version = 11 : i64} {
  func.func @_pe_dropout_kernel(%arg0: i32, %arg1: memref<1xi32, #tpu.memory_space<smem>>, %arg2: memref<8x2x32xf32, #tpu.memory_space<vmem>>, %arg3: memref<8x32xf32, #tpu.memory_space<vmem>>, %arg4: memref<8x2x32xf32, #tpu.memory_space<vmem>>) attributes {dimension_semantics = [#tpu.dimension_semantics<parallel>], iteration_bounds = array<i64: 1>, scalar_prefetch = 1 : i64, scratch_operands = 0 : i64, tpu.core_type = #tpu.core_type<tc>, window_params = [{transform_indices = @transform_0, window_bounds = array<i64: 8, 2, 32>}, {transform_indices = @transform_1, window_bounds = array<i64: 8, 32>}, {transform_indices = @transform_2, window_bounds = array<i64: 8, 2, 32>}]} {
    %c0 = arith.constant 0 : index
    %c0_0 = arith.constant 0 : index
    %c0_1 = arith.constant 0 : index
    %0 = vector.load %arg2[%c0, %c0_0, %c0_1] : memref<8x2x32xf32, #tpu.memory_space<vmem>>, vector<8x2x32xf32>
    %c0_2 = arith.constant 0 : index
    %c0_3 = arith.constant 0 : index
    %1 = vector.load %arg3[%c0_2, %c0_3] : memref<8x32xf32, #tpu.memory_space<vmem>>, vector<8x32xf32>
    %2 = vector.shape_cast %1 : vector<8x32xf32> to vector<8x1x32xf32>
    %3 = vector.broadcast %2 : vector<8x1x32xf32> to vector<8x2x32xf32>
    %4 = arith.addf %0, %3 : vector<8x2x32xf32>
    %5 = tpu.iota {dimensions = array<i32: 0>} : vector<8x2x32xi32>
    %6 = tpu.iota {dimensions = array<i32: 1>} : vector<8x2x32xi32>
    %7 = tpu.iota {dimensions = array<i32: 2>} : vector<8x2x32xi32>
    %c8_i32 = arith.constant 8 : i32
    %8 = arith.muli %arg0, %c8_i32 : i32
    %9 = vector.broadcast %8 : i32 to vector<8x2x32xi32>
    %10 = arith.addi %9, %5 : vector<8x2x32xi32>
    %c2_i32 = arith.constant 2 : i32
    %11 = vector.broadcast %c2_i32 : i32 to vector<8x2x32xi32>
    %12 = arith.muli %10, %11 : vector<8x2x32xi32>
    %13 = arith.addi %12, %6 : vector<8x2x32xi32>
    %c32_i32 = arith.constant 32 : i32
    %14 = vector.broadcast %c32_i32 : i32 to vector<8x2x32xi32>
    %15 = arith.muli %13, %14 : vector<8x2x32xi32>
    %16 = arith.addi %15, %7 : vector<8x2x32xi32>
    %c0_4 = arith.constant 0 : index
    %17 = memref.load %arg1[%c0_4] : memref<1xi32, #tpu.memory_space<smem>>
    %c-1640531527_i32 = arith.constant -1640531527 : i32
    %18 = arith.muli %17, %c-1640531527_i32 : i32
    %19 = vector.broadcast %18 : i32 to vector<8x2x32xi32>
    %20 = arith.xori %16, %19 : vector<8x2x32xi32>
    %c16_i32 = arith.constant 16 : i32
    %21 = vector.broadcast %c16_i32 : i32 to vector<8x2x32xi32>
    %22 = arith.shrui %20, %21 : vector<8x2x32xi32>
    %23 = arith.xori %20, %22 : vector<8x2x32xi32>
    %c2146121005_i32 = arith.constant 2146121005 : i32
    %24 = vector.broadcast %c2146121005_i32 : i32 to vector<8x2x32xi32>
    %25 = arith.muli %23, %24 : vector<8x2x32xi32>
    %c15_i32 = arith.constant 15 : i32
    %26 = vector.broadcast %c15_i32 : i32 to vector<8x2x32xi32>
    %27 = arith.shrui %25, %26 : vector<8x2x32xi32>
    %28 = arith.xori %25, %27 : vector<8x2x32xi32>
    %c-2073254261_i32 = arith.constant -2073254261 : i32
    %29 = vector.broadcast %c-2073254261_i32 : i32 to vector<8x2x32xi32>
    %30 = arith.muli %28, %29 : vector<8x2x32xi32>
    %c16_i32_5 = arith.constant 16 : i32
    %31 = vector.broadcast %c16_i32_5 : i32 to vector<8x2x32xi32>
    %32 = arith.shrui %30, %31 : vector<8x2x32xi32>
    %33 = arith.xori %30, %32 : vector<8x2x32xi32>
    %c429496729_i32 = arith.constant 429496729 : i32
    %34 = vector.broadcast %c429496729_i32 : i32 to vector<8x2x32xi32>
    %35 = arith.cmpi uge, %33, %34 : vector<8x2x32xi32>
    %cst = arith.constant 1.11111116 : f32
    %36 = vector.broadcast %cst : f32 to vector<8x2x32xf32>
    %37 = arith.mulf %4, %36 : vector<8x2x32xf32>
    %cst_6 = arith.constant 0.000000e+00 : f32
    %38 = vector.broadcast %cst_6 : f32 to vector<8x2x32xf32>
    %39 = arith.select %35, %37, %38 : vector<8x2x32xi1>, vector<8x2x32xf32>
    %c0_7 = arith.constant 0 : index
    %c0_8 = arith.constant 0 : index
    %c0_9 = arith.constant 0 : index
    %40 = vector.load %arg4[%c0_7, %c0_8, %c0_9] : memref<8x2x32xf32, #tpu.memory_space<vmem>>, vector<8x2x32xf32>
    tpu.vector_store %arg4[%c0_7, %c0_8, %c0_9], %39 {strides = array<i32>} : memref<8x2x32xf32, #tpu.memory_space<vmem>>, vector<8x2x32xf32>,
    return
  }
  func.func @transform_0(%arg0: i32, %arg1: memref<1xi32, #tpu.memory_space<smem>>) -> (i32, i32, i32) {
    %c0_i32 = arith.constant 0 : i32
    %c0_i32_0 = arith.constant 0 : i32
    %c0_i32_1 = arith.constant 0 : i32
    return %arg0, %c0_i32, %c0_i32_0 : i32, i32, i32
  }
  func.func @transform_1(%arg0: i32, %arg1: memref<1xi32, #tpu.memory_space<smem>>) -> (i32, i32) {
    %c0_i32 = arith.constant 0 : i32
    %c0_i32_0 = arith.constant 0 : i32
    return %arg0, %c0_i32 : i32, i32
  }
  func.func @transform_2(%arg0: i32, %arg1: memref<1xi32, #tpu.memory_space<smem>>) -> (i32, i32, i32) {
    %c0_i32 = arith.constant 0 : i32
    %c0_i32_0 = arith.constant 0 : i32
    %c0_i32_1 = arith.constant 0 : i32
    return %arg0, %c0_i32, %c0_i32_0 : i32, i32, i32
  }
}

</mosaic_0001>

<bundles_post_ra>
// kernel: tpu_custom_call.1
= control target key start
LH: loop header
LB: loop body
LE: loop exit
PB: predicated region body
PF: predicated region fallthrough
CT: control target
= control target key end

     0   :  { %9 = vsyncpa [#allocation5], 0  ;;  %s533_s0 = inlined_call_operand.<no memory space> [shape: s32[1], index: 0, kind: input, shape index: {}]   ;;  %s534_s1 = inlined_call_operand.hbm [shape: f32[8,2,32], index: 1, kind: input, shape index: {}]   ;;  %s535_s2 = inlined_call_operand.hbm [shape: f32[8,32], index: 2, kind: input, shape index: {}]   ;;  %s536_s3 = inlined_call_operand.hbm [shape: f32[8,2,32], index: 3, kind: output, shape index: {}]  }
   0x1   :  { %10 = vsyncpa [#allocation8], 0 }
   0x2   :  { %11 = vsyncpa [#allocation6], 0  ;;  %s396_s12 = smov [#allocation4]   ;;  %s324_s16 = scalar_lea.hbm %s534_s1, 256 }
   0x3   :  { %s17_s13 = sshll.u32 %s396_s12, 4  ;;  %p325_p0 = scmp.ne.s32.totalorder %s534_s1, %s324_s16  ;;  %s18_s13 = int_to_ptr.vmem [resolvable:$true] %s17_s13 }
   0x4   :  { %p328_p1 = scmp.lt.u32.totalorder %s324_s16, %s534_s1 }
   0x6   :  { %p330_p2 = pnand %p328_p1, %p325_p0 }
   0x8   :  { %333 = shalt.err (!%p330_p2)
}
   0x9   :  { %s334_s21 = scalar_lea.vmem %s18_s13, 256  ;;  %p339_p4 = scmp.lt.s32.totalorder %s18_s13, %s18_s13 }
   0xa   :  { %p335_p3 = scmp.ne.s32.totalorder %s18_s13, %s334_s21  ;;  %p340_p5 = scmp.lt.s32.totalorder %s334_s21, %s334_s21 }
   0xc   :  { %p341_p6 = por %p340_p5, %p339_p4 }
   0xe   :  { %p342_p7 = pnand %p341_p6, %p335_p3 }
  0x10   :  { %345 = shalt.err (!%p342_p7)
}
  0x11   :  { %s397_s22 = smov 32   ;;  %s398_s23 = smov 2  }
  0x12   :  { %23 = dma.hbm_to_vmem [thread:$0]  %s534_s1, 256, %s18_s13, [#allocation5], %s397_s22, %s397_s22, %s398_s23  }
  0x13   :  { %s399_s26 = smov [#allocation7]   ;;  %s346_s30 = scalar_lea.hbm %s535_s2, 128 }
  0x14   :  { %s30_s27 = sshll.u32 %s399_s26, 4  ;;  %p347_p8 = scmp.ne.s32.totalorder %s535_s2, %s346_s30  ;;  %s31_s27 = int_to_ptr.vmem [resolvable:$true] %s30_s27 }
  0x15   :  { %p350_p9 = scmp.lt.u32.totalorder %s346_s30, %s535_s2 }
  0x17   :  { %p352_p10 = pnand %p350_p9, %p347_p8 }
  0x19   :  { %355 = shalt.err (!%p352_p10)
}
  0x1a   :  { %s356_s8 = scalar_lea.vmem %s31_s27, 128  ;;  %p361_p12 = scmp.lt.s32.totalorder %s31_s27, %s31_s27 }
  0x1b   :  { %p357_p11 = scmp.ne.s32.totalorder %s31_s27, %s356_s8  ;;  %p362_p13 = scmp.lt.s32.totalorder %s356_s8, %s356_s8 }
  0x1d   :  { %p363_p0 = por %p362_p13, %p361_p12 }
  0x1f   :  { %p364_p1 = pnand %p363_p0, %p357_p11 }
  0x21   :  { %367 = shalt.err (!%p364_p1)
}
  0x22   :  { %33 = dma.hbm_to_vmem [thread:$0]  %s535_s2, 128, %s31_s27, [#allocation8]  }
  0x23   :  { %390 = dma.done.wait [#allocation5], 256  }
  0x24   :  { %391 = vsyncadd [#allocation5], 4294967040 }
  0x25   :  { %392 = dma.done.wait [#allocation8], 128  }
  0x26   :  { %393 = vsyncadd [#allocation8], 4294967168  ;;  %v54_v0 = vlaneseq  ;;  %v400_v1 = vmov 1966171168   ;;  %s193_s12 = smul.u32 2654435769, %s533_s0 }
  0x27   :  { %v52_v2 = vunpack.c.l.s4 %v400_v1  ;;  %v48_v15 = vld [vmem:[#allocation7] sm:$0xff]  ;;  %v40_v38 = vld [vmem:[#allocation4] sm:$0x3]  ;;  %v41_v48 = vld [vmem:[#allocation4 + $0x2] sm:$0x3]  ;;  %vm291_vm0 = vcmask 254976  }
  0x28   :  { %v452_v3 = vshrl.u32 %v54_v0, 7  ;;  %v454_v4 = vand.u32 127, %v54_v0  ;;  %v462_v10 = vstv %s193_s12  ;;  %v50_v41 = vcombine.high %v48_v15, %v48_v15  ;;  %v42_v58 = vld [vmem:[#allocation4 + $0x4] sm:$0x3]  ;;  %v43_v63 = vld [vmem:[#allocation4 + $0x6] sm:$0x3] }
  0x29   :  { %v53_v5 = vunpack.c.0.s8 %v52_v2  ;;  %s401_s0 = smov [#allocation9]  }
  0x2a   :  { %v176_v6 = vmul.u32 32, %v452_v3  ;;  %v169_v7 = vadd.s32 2, %v452_v3  ;;  %v170_v8 = vadd.s32 4, %v452_v3  ;;  %v171_v11 = vadd.s32 6, %v452_v3  ;;  %s305_s2 = sshll.u32 %s401_s0, 4  ;;  %s306_s2 = int_to_ptr.vmem [resolvable:$true] %s305_s2 }
  0x2b   :  { %v460_v9 = vsub.s32 %v53_v5, %v452_v3  ;;  %v172_v17 = vadd.s32 8, %v452_v3  ;;  %v472_v22 = vsub.s32 0, %v452_v3  ;;  %v173_v42 = vadd.s32 10, %v452_v3  ;;  %s368_s13 = scalar_lea.vmem %s306_s2, 256  ;;  %p373_p3 = scmp.lt.s32.totalorder %s306_s2, %s306_s2 }
  0x2c   :  { %v184_v12 = vadd.s32 %v176_v6, %v454_v4  ;;  %v177_v13 = vmul.u32 32, %v169_v7  ;;  %v178_v14 = vmul.u32 32, %v170_v8  ;;  %v485_v51 = vadd.s32 12, %v452_v3  ;;  %p369_p2 = scmp.ne.s32.totalorder %s306_s2, %s368_s13  ;;  %p374_p4 = scmp.lt.s32.totalorder %s368_s13, %s368_s13 }
  0x2d   :  { %v179_v16 = vmul.u32 32, %v171_v11  ;;  %v57_v18 = vrot.slane %v48_v15, %v460_v9  ;;  %v180_v33 = vmul.u32 32, %v172_v17  ;;  %v64_v60 = vrot.slane %v50_v41, %v460_v9 }
  0x2e   :  { %v195_v19 = vxor.u32 %v462_v10, %v184_v12  ;;  %v185_v20 = vadd.s32 %v177_v13, %v454_v4  ;;  %v186_v21 = vadd.s32 %v178_v14, %v454_v4  ;;  %v181_v1 = vmul.u32 32, %v173_v42  ;;  %p375_p5 = por %p374_p4, %p373_p3 }
  0x2f   :  { %v187_v23 = vadd.s32 %v179_v16, %v454_v4  ;;  %v73_v24 = vrot.slane %v57_v18, %v460_v9  ;;  %v65_v26 = vcombine.high %v57_v18, %v57_v18  ;;  %v188_v50 = vadd.s32 %v180_v33, %v454_v4 }
  0x30   :  { %v203_v25 = vshrl.u32 %v195_v19, 16  ;;  %v196_v27 = vxor.u32 %v462_v10, %v185_v20  ;;  %v197_v28 = vxor.u32 %v462_v10, %v186_v21  ;;  %v491_v6 = vrot.slane %v64_v60, %v460_v9  ;;  %p376_p6 = pnand %p375_p5, %p369_p2 }
  0x31   :  { %v198_v29 = vxor.u32 %v462_v10, %v187_v23  ;;  %v87_v31 = vrot.slane %v65_v26, %v460_v9  ;;  %v102_v34 = vrot.slane %v73_v24, %v472_v22  ;;  %v95_v35 = vcombine.high %v73_v24, %v73_v24 }
  0x32   :  { %v211_v30 = vxor.u32 %v203_v25, %v195_v19  ;;  %v204_v32 = vshrl.u32 %v196_v27, 16  ;;  %v205_v36 = vshrl.u32 %v197_v28, 16  ;;  %v199_v7 = vxor.u32 %v462_v10, %v188_v50 }
  0x33   :  { %v206_v37 = vshrl.u32 %v198_v29, 16  ;;  %v106_v43 = vrot.slane %v87_v31, %v472_v22  ;;  %v97_v45 = vcombine.high %v87_v31, %v87_v31  ;;  %v139_v52 = vadd.f32 %v102_v34, %v40_v38  ;;  %v44_v38 = vld [vmem:[#allocation4 + $0x8] sm:$0x3] }
  0x34   :  { %v219_v39 = vmul.u32 2146121005, %v211_v30  ;;  %v212_v40 = vxor.u32 %v204_v32, %v196_v27  ;;  %v213_v44 = vxor.u32 %v205_v36, %v197_v28  ;;  %v110_v53 = vrot.slane %v95_v35, %v472_v22 }
  0x35   :  { %v214_v46 = vxor.u32 %v206_v37, %v198_v29  ;;  %v114_v59 = vrot.slane %v97_v45, %v472_v22  ;;  %v140_v61 = vadd.f32 %v106_v43, %v41_v48  ;;  %v275_v8 = vmul.f32 1.1111112, %v139_v52 }
  0x36   :  { %v227_v47 = vshrl.u32 %v219_v39, 15  ;;  %v220_v49 = vmul.u32 2146121005, %v212_v40  ;;  %v221_v54 = vmul.u32 2146121005, %v213_v44  ;;  %v141_v11 = vadd.f32 %v110_v53, %v42_v58 }
  0x37   :  { %v222_v55 = vmul.u32 2146121005, %v214_v46  ;;  %v142_v16 = vadd.f32 %v114_v59, %v43_v63  ;;  %v207_v17 = vshrl.u32 %v199_v7, 16  ;;  %v276_v18 = vmul.f32 1.1111112, %v140_v61 }
  0x38   :  { %v235_v56 = vxor.u32 %v227_v47, %v219_v39  ;;  %v228_v57 = vshrl.u32 %v220_v49, 15  ;;  %v229_v62 = vshrl.u32 %v221_v54, 15  ;;  %v189_v21 = vadd.s32 %v181_v1, %v454_v4 }
  0x39   :  { %v230_v0 = vshrl.u32 %v222_v55, 15  ;;  %v118_v25 = vrot.slane %v491_v6, %v472_v22  ;;  %v215_v26 = vxor.u32 %v207_v17, %v199_v7  ;;  %v277_v28 = vmul.f32 1.1111112, %v141_v11 }
  0x3a   :  { %v243_v2 = vmul.u32 2221713035, %v235_v56  ;;  %v236_v5 = vxor.u32 %v228_v57, %v220_v49  ;;  %v237_v12 = vxor.u32 %v229_v62, %v221_v54  ;;  %v200_v30 = vxor.u32 %v462_v10, %v189_v21  ;;  %v45_v56 = vld [vmem:[#allocation4 + $0xa] sm:$0x3] }
  0x3b   :  { %v238_v13 = vxor.u32 %v230_v0, %v222_v55  ;;  %v278_v32 = vmul.f32 1.1111112, %v142_v16  ;;  %v223_v33 = vmul.u32 2146121005, %v215_v26  ;;  %v66_v37 = vcombine.high %v64_v60, %v64_v60 }
  0x3c   :  { %v251_v14 = vshrl.u32 %v243_v2, 16  ;;  %v244_v15 = vmul.u32 2221713035, %v236_v5  ;;  %v245_v19 = vmul.u32 2221713035, %v237_v12  ;;  %v208_v40 = vshrl.u32 %v200_v30, 16 }
  0x3d   :  { %v246_v20 = vmul.u32 2221713035, %v238_v13  ;;  %v231_v39 = vshrl.u32 %v223_v33, 15  ;;  %v182_v42 = vmul.u32 32, %v485_v51  ;;  %v143_v47 = vadd.f32 %v118_v25, %v44_v38 }
  0x3e   :  { %v259_v23 = vxor.u32 %v251_v14, %v243_v2  ;;  %v252_v24 = vshrl.u32 %v244_v15, 16  ;;  %v253_v27 = vshrl.u32 %v245_v19, 16  ;;  %v216_v46 = vxor.u32 %v208_v40, %v200_v30  ;;  %v46_v14 = vld [vmem:[#allocation4 + $0xc] sm:$0x3] }
  0x3f   :  { %v254_v29 = vshrl.u32 %v246_v20, 16  ;;  %v239_v45 = vxor.u32 %v231_v39, %v223_v33  ;;  %v94_v48 = vrot.slane %v66_v37, %v460_v9  ;;  %v190_v49 = vadd.s32 %v182_v42, %v454_v4 }
  0x40   :  { %vm267_vm1 = vcmp.ge.u32.totalorder %v259_v23, 429496729  ;;  %v260_v31 = vxor.u32 %v252_v24, %v244_v15  ;;  %v261_v35 = vxor.u32 %v253_v27, %v245_v19  ;;  %v224_v52 = vmul.u32 2146121005, %v216_v46  ;;  %v47_v23 = vld [vmem:[#allocation4 + $0xe] sm:$0x3] }
  0x41   :  { %v283_v34 = vsel %vm267_vm1, %v275_v8, 0.0  ;;  %v262_v36 = vxor.u32 %v254_v29, %v246_v20  ;;  %v247_v50 = vmul.u32 2221713035, %v239_v45  ;;  %v175_v53 = vadd.s32 14, %v452_v3 }
  0x42   :  { %292 = vst.msk [vmem:[#allocation9] sm:$0x3] %vm291_vm0, %v283_v34  ;;  %vm268_vm2 = vcmp.ge.u32.totalorder %v260_v31, 429496729  ;;  %vm269_vm3 = vcmp.ge.u32.totalorder %v261_v35, 429496729  ;;  %v122_v51 = vrot.slane %v94_v48, %v472_v22  ;;  %v201_v54 = vxor.u32 %v462_v10, %v190_v49 }
  0x43   :  { %v284_v41 = vsel %vm268_vm2, %v276_v18, 0.0  ;;  %vm270_vm4 = vcmp.ge.u32.totalorder %v262_v36, 429496729  ;;  %v285_v43 = vsel %vm269_vm3, %v277_v28, 0.0  ;;  %v255_v55 = vshrl.u32 %v247_v50, 16 }
  0x44   :  { %293 = vst.msk [vmem:[#allocation9 + $0x2] sm:$0x3] %vm291_vm0, %v284_v41  ;;  %v286_v44 = vsel %vm270_vm4, %v278_v32, 0.0  ;;  %294 = vst.msk [vmem:[#allocation9 + $0x4] sm:$0x3] %vm291_vm0, %v285_v43  ;;  %v232_v57 = vshrl.u32 %v224_v52, 15  ;;  %v96_v9 = vcombine.high %v491_v6, %v491_v6  ;;  %v144_v0 = vadd.f32 %v122_v51, %v45_v56 }
  0x45   :  { %295 = vst.msk [vmem:[#allocation9 + $0x6] sm:$0x3] %vm291_vm0, %v286_v44  ;;  %v183_v58 = vmul.u32 32, %v175_v53  ;;  %v279_v59 = vmul.f32 1.1111112, %v143_v47  ;;  %v209_v60 = vshrl.u32 %v201_v54, 16  ;;  %v263_v61 = vxor.u32 %v255_v55, %v247_v50 }
  0x46   :  { %v240_v62 = vxor.u32 %v232_v57, %v224_v52  ;;  %v126_v11 = vrot.slane %v96_v9, %v472_v22  ;;  %v280_v13 = vmul.f32 1.1111112, %v144_v0  ;;  %v98_v6 = vcombine.high %v94_v48, %v94_v48 }
  0x47   :  { %v191_v63 = vadd.s32 %v183_v58, %v454_v4  ;;  %v217_v1 = vxor.u32 %v209_v60, %v201_v54  ;;  %vm271_vm5 = vcmp.ge.u32.totalorder %v263_v61, 429496729 }
  0x48   :  { %v248_v3 = vmul.u32 2221713035, %v240_v62  ;;  %v287_v5 = vsel %vm271_vm5, %v279_v59, 0.0  ;;  %v145_v18 = vadd.f32 %v126_v11, %v46_v14  ;;  %v130_v21 = vrot.slane %v98_v6, %v472_v22 }
  0x49   :  { %v202_v2 = vxor.u32 %v462_v10, %v191_v63  ;;  %v225_v7 = vmul.u32 2146121005, %v217_v1  ;;  %296 = vst.msk [vmem:[#allocation9 + $0x8] sm:$0x3] %vm291_vm0, %v287_v5 }
  0x4a   :  { %v256_v8 = vshrl.u32 %v248_v3, 16  ;;  %v281_v26 = vmul.f32 1.1111112, %v145_v18  ;;  %v146_v29 = vadd.f32 %v130_v21, %v47_v23 }
  0x4b   :  { %v210_v12 = vshrl.u32 %v202_v2, 16  ;;  %v233_v15 = vshrl.u32 %v225_v7, 15 }
  0x4c   :  { %v264_v16 = vxor.u32 %v256_v8, %v248_v3  ;;  %v282_v33 = vmul.f32 1.1111112, %v146_v29 }
  0x4d   :  { %v218_v4 = vxor.u32 %v210_v12, %v202_v2  ;;  %v241_v17 = vxor.u32 %v233_v15, %v225_v7 }
  0x4e   :  { %vm272_vm6 = vcmp.ge.u32.totalorder %v264_v16, 429496729 }
  0x4f   :  { %v226_v19 = vmul.u32 2146121005, %v218_v4  ;;  %v288_v20 = vsel %vm272_vm6, %v280_v13, 0.0  ;;  %v249_v10 = vmul.u32 2221713035, %v241_v17 }
  0x50   :  { %297 = vst.msk [vmem:[#allocation9 + $0xa] sm:$0x3] %vm291_vm0, %v288_v20 }
  0x51   :  { %v234_v24 = vshrl.u32 %v226_v19, 15  ;;  %v257_v25 = vshrl.u32 %v249_v10, 16 }
  0x53   :  { %v242_v27 = vxor.u32 %v234_v24, %v226_v19  ;;  %v265_v28 = vxor.u32 %v257_v25, %v249_v10 }
  0x55   :  { %v250_v30 = vmul.u32 2221713035, %v242_v27  ;;  %vm273_vm7 = vcmp.ge.u32.totalorder %v265_v28, 429496729 }
  0x56   :  { %v289_v31 = vsel %vm273_vm7, %v281_v26, 0.0 }
  0x57   :  { %v258_v32 = vshrl.u32 %v250_v30, 16  ;;  %298 = vst.msk [vmem:[#allocation9 + $0xc] sm:$0x3] %vm291_vm0, %v289_v31 }
  0x59   :  { %v266_v34 = vxor.u32 %v258_v32, %v250_v30 }
  0x5b   :  { %vm274_vm8 = vcmp.ge.u32.totalorder %v266_v34, 429496729 }
  0x5c   :  { %v290_v22 = vsel %vm274_vm8, %v282_v33, 0.0 }
  0x5d   :  { %299 = vst.msk [vmem:[#allocation9 + $0xe] sm:$0x3] %vm291_vm0, %v290_v22 }
  0x5e   :  { %379 = shalt.err (!%p376_p6)
}
  0x5f   :  { %s380_s16 = scalar_lea.hbm %s536_s3, 256 }
  0x60   :  { %p381_p7 = scmp.ne.s32.totalorder %s536_s3, %s380_s16  ;;  %p384_p8 = scmp.lt.u32.totalorder %s380_s16, %s536_s3 }
  0x62   :  { %p386_p9 = pnand %p384_p8, %p381_p7 }
  0x64   :  { %389 = shalt.err (!%p386_p9)
}
  0x65   :  { %311 = dma.vmem_to_hbm [thread:$0]  %s306_s2, 256, %s536_s3, [#allocation6], %s397_s22, %s397_s22, %s398_s23  }
  0x66   :  { %394 = dma.done.wait [#allocation6], 256  }
  0x67   :  { %395 = vsyncadd [#allocation6], 4294967040 }
  0x68   :  { %315 = vsyncpa [#allocation5], 1 }
  0x69   :  { %316 = vsyncpa [#allocation8], 1 }
  0x6a   :  { %317 = vsyncpa [#allocation6], 1 }

</bundles_post_ra>
